<compile_context>
chip_gen: v5e
topology: v5e:2x2
jax: 0.10.0
libtpu: 0.0.40
codegen_flags: <defaults>
</compile_context>

<pallas_src>
import jax
import jax.numpy as jnp
from jax import lax
from jax.experimental import pallas as pl
from jax.experimental.pallas import tpu as pltpu


def _make_kernel(H, W, C, K, Cout):
    HW = H * W
    pad = K // 2

    def kernel(x_ref, idx_ref, wdw_ref, wpw_ref, b_ref, o_ref):
        # x_ref  : (1, C, HW)      one batch element, spatial flattened on lanes
        # idx_ref: (2, HW) int32   row 0 = h index, row 1 = w index per position
        # wdw_ref: (K*K, C, 1)     depthwise taps, one (C,1) column per tap
        # wpw_ref: (C, Cout, 1)    pointwise weight, one (Cout,1) column per c_in
        # b_ref  : (Cout, 1)       pointwise bias
        # o_ref  : (1, Cout, HW)   lane-dense output block
        x = x_ref[0].astype(jnp.float32)                    # (C, HW)
        wdw = wdw_ref[...].astype(jnp.float32)              # (K*K, C, 1)
        h_idx = idx_ref[0:1, :]                             # (1, HW)
        w_idx = idx_ref[1:2, :]                             # (1, HW)

        # Doubled copy along lanes: tap offset (dh, dw) becomes the constant
        # lane slice xx[:, r:r+HW] with r = (dh*W + dw) % HW; wrap positions
        # are exactly the out-of-image positions and get masked to zero.
        xx = jnp.concatenate([x, x], axis=1)                # (C, 2*HW)

        # ---- depthwise conv ('same', stride 1) on the VPU -------------------
        acc = jnp.zeros((C, HW), jnp.float32)
        for kh in range(K):
            dh = kh - pad
            for kw in range(K):
                dw = kw - pad
                s = dh * W + dw
                r = s % HW
                shifted = x if s == 0 else xx[:, r:r + HW]  # (C, HW)
                conds = []
                if dh < 0:
                    conds.append(h_idx >= -dh)
                if dh > 0:
                    conds.append(h_idx < H - dh)
                if dw < 0:
                    conds.append(w_idx >= -dw)
                if dw > 0:
                    conds.append(w_idx < W - dw)
                if conds:
                    valid = conds[0]
                    for extra in conds[1:]:
                        valid = valid & extra
                    shifted = jnp.where(valid, shifted, 0.0)
                acc = acc + shifted * wdw[kh * K + kw]      # (C,1) lane-bcast

        # ---- pointwise 1x1 conv + bias (tiny C/Cout -> VPU, not MXU) ---------
        wpw = wpw_ref[...].astype(jnp.float32)              # (C, Cout, 1)
        out = jnp.zeros((Cout, HW), jnp.float32)
        for ci in range(C):
            out = out + acc[ci:ci + 1, :] * wpw[ci]         # (1,HW)*(Cout,1)
        out = out + b_ref[...].astype(jnp.float32)          # + (Cout,1)

        o_ref[...] = out[None].astype(o_ref.dtype)          # lane-dense store

    return kernel


def separable_conv2d(x_nchw, w_dw, w_pw, b_pw):
    """SeparableConv2d forward, stride=1, padding='same' (odd kernel size).

    x_nchw : (N, C, H, W)     float32
    w_dw   : (C, 1, K, K)     PyTorch depthwise weight (groups=C, bias=False)
    w_pw   : (Cout, C, 1, 1)  PyTorch pointwise weight
    b_pw   : (Cout,)          pointwise bias
    returns: (N, Cout, H, W)
    """
    N, C, H, W = x_nchw.shape
    K = w_dw.shape[-1]
    Cout = w_pw.shape[0]
    assert K % 2 == 1, "padding='same' path implemented for odd kernel sizes"
    HW = H * W

    # Free reshape only: activations stay NCHW, no transpose / pad HBM copies.
    x_flat = x_nchw.reshape(N, C, HW)

    # Tiny parameter relayouts + per-position (h, w) indices for edge masking.
    wdw = jnp.transpose(w_dw[:, 0].reshape(C, K * K), (1, 0))[:, :, None]  # (K*K,C,1)
    wpw = jnp.transpose(w_pw[:, :, 0, 0], (1, 0))[:, :, None]              # (C,Cout,1)
    b = b_pw.reshape(Cout, 1)
    pos = jnp.arange(HW, dtype=jnp.int32)
    hw_idx = jnp.stack([pos // W, pos % W], axis=0)                        # (2, HW)

    kernel = _make_kernel(H, W, C, K, Cout)

    out_flat = pl.pallas_call(
        kernel,
        out_shape=jax.ShapeDtypeStruct((N, Cout, HW), x_nchw.dtype),
        grid_spec=pltpu.PrefetchScalarGridSpec(
            num_scalar_prefetch=0,
            grid=(N,),
            in_specs=[
                pl.BlockSpec((1, C, HW), lambda n: (n, 0, 0)),
                pl.BlockSpec((2, HW), lambda n: (0, 0)),
                pl.BlockSpec((K * K, C, 1), lambda n: (0, 0, 0)),
                pl.BlockSpec((C, Cout, 1), lambda n: (0, 0, 0)),
                pl.BlockSpec((Cout, 1), lambda n: (0, 0)),
            ],
            out_specs=pl.BlockSpec((1, Cout, HW), lambda n: (n, 0, 0)),
        ),
        compiler_params=pltpu.CompilerParams(
            dimension_semantics=("parallel",)),
    )(x_flat, hw_idx, wdw, wpw, b)

    return out_flat.reshape(N, Cout, H, W)   # free reshape, still NCHW


def _reference(x_nchw, w_dw, w_pw, b_pw):
    """Pure-JAX reference (lax convolutions) for validation."""
    C = x_nchw.shape[1]
    dw = lax.conv_general_dilated(
        x_nchw, w_dw, window_strides=(1, 1), padding="SAME",
        dimension_numbers=("NCHW", "OIHW", "NCHW"), feature_group_count=C)
    pw = lax.conv_general_dilated(
        dw, w_pw, window_strides=(1, 1), padding="VALID",
        dimension_numbers=("NCHW", "OIHW", "NCHW"))
    return pw + b_pw.reshape(1, -1, 1, 1)


if __name__ == "__main__":
    key = jax.random.PRNGKey(0)
    k_x, k_dw, k_pw, k_b = jax.random.split(key, 4)

    # Small shapes consistent with the module: N=2, C_in=4, C_out=8, H=W=16, K=3.
    N, C_in, C_out, H, W, K = 2, 4, 8, 16, 16, 3

    x = jax.random.normal(k_x, (N, C_in, H, W), dtype=jnp.float32)
    # Deterministic parameter init (module __init__ shapes; synthetic, not a checkpoint).
    w_depthwise = jax.random.normal(k_dw, (C_in, 1, K, K), dtype=jnp.float32) * 0.1
    w_pointwise = jax.random.normal(k_pw, (C_out, C_in, 1, 1), dtype=jnp.float32) * 0.1
    b_pointwise = jax.random.normal(k_b, (C_out,), dtype=jnp.float32) * 0.1

    out = separable_conv2d(x, w_depthwise, w_pointwise, b_pointwise)
    out = jax.block_until_ready(out)

    ref = jax.block_until_ready(_reference(x, w_depthwise, w_pointwise, b_pointwise))
    assert out.shape == (N, C_out, H, W)
    assert jnp.allclose(out, ref, atol=1e-4, rtol=1e-4)

    print("KERNEL_OK")
</pallas_src>

<mosaic_0001>
module attributes {stable_mosaic.version = 11 : i64} {
  func.func @kernel(%arg0: i32, %arg1: memref<1x4x256xf32, #tpu.memory_space<vmem>>, %arg2: memref<2x256xi32, #tpu.memory_space<vmem>>, %arg3: memref<9x4x1xf32, #tpu.memory_space<vmem>>, %arg4: memref<4x8x1xf32, #tpu.memory_space<vmem>>, %arg5: memref<8x1xf32, #tpu.memory_space<vmem>>, %arg6: memref<1x8x256xf32, #tpu.memory_space<vmem>>) attributes {dimension_semantics = [#tpu.dimension_semantics<parallel>], iteration_bounds = array<i64: 2>, scalar_prefetch = 0 : i64, scratch_operands = 0 : i64, tpu.core_type = #tpu.core_type<tc>, window_params = [{transform_indices = @transform_0, window_bounds = array<i64: 1, 4, 256>}, {pipeline_mode = #tpu.pipeline_mode<synchronous>, transform_indices = @transform_1, window_bounds = array<i64: 2, 256>}, {pipeline_mode = #tpu.pipeline_mode<synchronous>, transform_indices = @transform_2, window_bounds = array<i64: 9, 4, 1>}, {pipeline_mode = #tpu.pipeline_mode<synchronous>, transform_indices = @transform_3, window_bounds = array<i64: 4, 8, 1>}, {pipeline_mode = #tpu.pipeline_mode<synchronous>, transform_indices = @transform_4, window_bounds = array<i64: 8, 1>}, {transform_indices = @transform_5, window_bounds = array<i64: 1, 8, 256>}]} {
    %c0 = arith.constant 0 : index
    %c0_0 = arith.constant 0 : index
    %c0_1 = arith.constant 0 : index
    %0 = vector.load %arg1[%c0, %c0_0, %c0_1] : memref<1x4x256xf32, #tpu.memory_space<vmem>>, vector<1x4x256xf32>
    %1 = vector.shape_cast %0 : vector<1x4x256xf32> to vector<4x256xf32>
    %c0_2 = arith.constant 0 : index
    %c0_3 = arith.constant 0 : index
    %c0_4 = arith.constant 0 : index
    %2 = vector.load %arg3[%c0_2, %c0_3, %c0_4] : memref<9x4x1xf32, #tpu.memory_space<vmem>>, vector<9x4x1xf32>
    %c0_5 = arith.constant 0 : index
    %c0_6 = arith.constant 0 : index
    %3 = vector.load %arg2[%c0_5, %c0_6] : memref<2x256xi32, #tpu.memory_space<vmem>>, vector<1x256xi32>
    %c1 = arith.constant 1 : index
    %c0_7 = arith.constant 0 : index
    %4 = vector.load %arg2[%c1, %c0_7] : memref<2x256xi32, #tpu.memory_space<vmem>>, vector<1x256xi32>
    %5 = tpu.concatenate %1, %1 in 1 : vector<4x256xf32>, vector<4x256xf32> -> vector<4x512xf32>
    %cst = arith.constant 0.000000e+00 : f32
    %6 = vector.broadcast %cst : f32 to vector<4x256xf32>
    %7 = vector.extract_strided_slice %5 {offsets = [0, 239], sizes = [4, 256], strides = [1, 1]} : vector<4x512xf32> to vector<4x256xf32>
    %c1_i32 = arith.constant 1 : i32
    %8 = vector.broadcast %c1_i32 : i32 to vector<1x256xi32>
    %9 = arith.cmpi sge, %3, %8 : vector<1x256xi32>
    %c1_i32_8 = arith.constant 1 : i32
    %10 = vector.broadcast %c1_i32_8 : i32 to vector<1x256xi32>
    %11 = arith.cmpi sge, %4, %10 : vector<1x256xi32>
    %12 = arith.andi %9, %11 : vector<1x256xi1>
    %cst_9 = arith.constant 0.000000e+00 : f32
    %13 = vector.shape_cast %12 : vector<1x256xi1> to vector<1x256xi1>
    %14 = vector.broadcast %13 : vector<1x256xi1> to vector<4x256xi1>
    %15 = vector.broadcast %cst_9 : f32 to vector<4x256xf32>
    %16 = arith.select %14, %7, %15 : vector<4x256xi1>, vector<4x256xf32>
    %17 = vector.extract_strided_slice %2 {offsets = [0, 0, 0], sizes = [1, 4, 1], strides = [1, 1, 1]} : vector<9x4x1xf32> to vector<1x4x1xf32>
    %18 = vector.shape_cast %17 : vector<1x4x1xf32> to vector<4x1xf32>
    %19 = vector.broadcast %18 : vector<4x1xf32> to vector<4x256xf32>
    %20 = arith.mulf %16, %19 : vector<4x256xf32>
    %21 = arith.addf %6, %20 : vector<4x256xf32>
    %22 = vector.extract_strided_slice %5 {offsets = [0, 240], sizes = [4, 256], strides = [1, 1]} : vector<4x512xf32> to vector<4x256xf32>
    %c1_i32_10 = arith.constant 1 : i32
    %23 = vector.broadcast %c1_i32_10 : i32 to vector<1x256xi32>
    %24 = arith.cmpi sge, %3, %23 : vector<1x256xi32>
    %cst_11 = arith.constant 0.000000e+00 : f32
    %25 = vector.shape_cast %24 : vector<1x256xi1> to vector<1x256xi1>
    %26 = vector.broadcast %25 : vector<1x256xi1> to vector<4x256xi1>
    %27 = vector.broadcast %cst_11 : f32 to vector<4x256xf32>
    %28 = arith.select %26, %22, %27 : vector<4x256xi1>, vector<4x256xf32>
    %29 = vector.extract_strided_slice %2 {offsets = [1, 0, 0], sizes = [1, 4, 1], strides = [1, 1, 1]} : vector<9x4x1xf32> to vector<1x4x1xf32>
    %30 = vector.shape_cast %29 : vector<1x4x1xf32> to vector<4x1xf32>
    %31 = vector.broadcast %30 : vector<4x1xf32> to vector<4x256xf32>
    %32 = arith.mulf %28, %31 : vector<4x256xf32>
    %33 = arith.addf %21, %32 : vector<4x256xf32>
    %34 = vector.extract_strided_slice %5 {offsets = [0, 241], sizes = [4, 256], strides = [1, 1]} : vector<4x512xf32> to vector<4x256xf32>
    %c1_i32_12 = arith.constant 1 : i32
    %35 = vector.broadcast %c1_i32_12 : i32 to vector<1x256xi32>
    %36 = arith.cmpi sge, %3, %35 : vector<1x256xi32>
    %c15_i32 = arith.constant 15 : i32
    %37 = vector.broadcast %c15_i32 : i32 to vector<1x256xi32>
    %38 = arith.cmpi slt, %4, %37 : vector<1x256xi32>
    %39 = arith.andi %36, %38 : vector<1x256xi1>
    %cst_13 = arith.constant 0.000000e+00 : f32
    %40 = vector.shape_cast %39 : vector<1x256xi1> to vector<1x256xi1>
    %41 = vector.broadcast %40 : vector<1x256xi1> to vector<4x256xi1>
    %42 = vector.broadcast %cst_13 : f32 to vector<4x256xf32>
    %43 = arith.select %41, %34, %42 : vector<4x256xi1>, vector<4x256xf32>
    %44 = vector.extract_strided_slice %2 {offsets = [2, 0, 0], sizes = [1, 4, 1], strides = [1, 1, 1]} : vector<9x4x1xf32> to vector<1x4x1xf32>
    %45 = vector.shape_cast %44 : vector<1x4x1xf32> to vector<4x1xf32>
    %46 = vector.broadcast %45 : vector<4x1xf32> to vector<4x256xf32>
    %47 = arith.mulf %43, %46 : vector<4x256xf32>
    %48 = arith.addf %33, %47 : vector<4x256xf32>
    %49 = vector.extract_strided_slice %5 {offsets = [0, 255], sizes = [4, 256], strides = [1, 1]} : vector<4x512xf32> to vector<4x256xf32>
    %c1_i32_14 = arith.constant 1 : i32
    %50 = vector.broadcast %c1_i32_14 : i32 to vector<1x256xi32>
    %51 = arith.cmpi sge, %4, %50 : vector<1x256xi32>
    %cst_15 = arith.constant 0.000000e+00 : f32
    %52 = vector.shape_cast %51 : vector<1x256xi1> to vector<1x256xi1>
    %53 = vector.broadcast %52 : vector<1x256xi1> to vector<4x256xi1>
    %54 = vector.broadcast %cst_15 : f32 to vector<4x256xf32>
    %55 = arith.select %53, %49, %54 : vector<4x256xi1>, vector<4x256xf32>
    %56 = vector.extract_strided_slice %2 {offsets = [3, 0, 0], sizes = [1, 4, 1], strides = [1, 1, 1]} : vector<9x4x1xf32> to vector<1x4x1xf32>
    %57 = vector.shape_cast %56 : vector<1x4x1xf32> to vector<4x1xf32>
    %58 = vector.broadcast %57 : vector<4x1xf32> to vector<4x256xf32>
    %59 = arith.mulf %55, %58 : vector<4x256xf32>
    %60 = arith.addf %48, %59 : vector<4x256xf32>
    %61 = vector.extract_strided_slice %2 {offsets = [4, 0, 0], sizes = [1, 4, 1], strides = [1, 1, 1]} : vector<9x4x1xf32> to vector<1x4x1xf32>
    %62 = vector.shape_cast %61 : vector<1x4x1xf32> to vector<4x1xf32>
    %63 = vector.broadcast %62 : vector<4x1xf32> to vector<4x256xf32>
    %64 = arith.mulf %1, %63 : vector<4x256xf32>
    %65 = arith.addf %60, %64 : vector<4x256xf32>
    %66 = vector.extract_strided_slice %5 {offsets = [0, 1], sizes = [4, 256], strides = [1, 1]} : vector<4x512xf32> to vector<4x256xf32>
    %c15_i32_16 = arith.constant 15 : i32
    %67 = vector.broadcast %c15_i32_16 : i32 to vector<1x256xi32>
    %68 = arith.cmpi slt, %4, %67 : vector<1x256xi32>
    %cst_17 = arith.constant 0.000000e+00 : f32
    %69 = vector.shape_cast %68 : vector<1x256xi1> to vector<1x256xi1>
    %70 = vector.broadcast %69 : vector<1x256xi1> to vector<4x256xi1>
    %71 = vector.broadcast %cst_17 : f32 to vector<4x256xf32>
    %72 = arith.select %70, %66, %71 : vector<4x256xi1>, vector<4x256xf32>
    %73 = vector.extract_strided_slice %2 {offsets = [5, 0, 0], sizes = [1, 4, 1], strides = [1, 1, 1]} : vector<9x4x1xf32> to vector<1x4x1xf32>
    %74 = vector.shape_cast %73 : vector<1x4x1xf32> to vector<4x1xf32>
    %75 = vector.broadcast %74 : vector<4x1xf32> to vector<4x256xf32>
    %76 = arith.mulf %72, %75 : vector<4x256xf32>
    %77 = arith.addf %65, %76 : vector<4x256xf32>
    %78 = vector.extract_strided_slice %5 {offsets = [0, 15], sizes = [4, 256], strides = [1, 1]} : vector<4x512xf32> to vector<4x256xf32>
    %c15_i32_18 = arith.constant 15 : i32
    %79 = vector.broadcast %c15_i32_18 : i32 to vector<1x256xi32>
    %80 = arith.cmpi slt, %3, %79 : vector<1x256xi32>
    %c1_i32_19 = arith.constant 1 : i32
    %81 = vector.broadcast %c1_i32_19 : i32 to vector<1x256xi32>
    %82 = arith.cmpi sge, %4, %81 : vector<1x256xi32>
    %83 = arith.andi %80, %82 : vector<1x256xi1>
    %cst_20 = arith.constant 0.000000e+00 : f32
    %84 = vector.shape_cast %83 : vector<1x256xi1> to vector<1x256xi1>
    %85 = vector.broadcast %84 : vector<1x256xi1> to vector<4x256xi1>
    %86 = vector.broadcast %cst_20 : f32 to vector<4x256xf32>
    %87 = arith.select %85, %78, %86 : vector<4x256xi1>, vector<4x256xf32>
    %88 = vector.extract_strided_slice %2 {offsets = [6, 0, 0], sizes = [1, 4, 1], strides = [1, 1, 1]} : vector<9x4x1xf32> to vector<1x4x1xf32>
    %89 = vector.shape_cast %88 : vector<1x4x1xf32> to vector<4x1xf32>
    %90 = vector.broadcast %89 : vector<4x1xf32> to vector<4x256xf32>
    %91 = arith.mulf %87, %90 : vector<4x256xf32>
    %92 = arith.addf %77, %91 : vector<4x256xf32>
    %93 = vector.extract_strided_slice %5 {offsets = [0, 16], sizes = [4, 256], strides = [1, 1]} : vector<4x512xf32> to vector<4x256xf32>
    %c15_i32_21 = arith.constant 15 : i32
    %94 = vector.broadcast %c15_i32_21 : i32 to vector<1x256xi32>
    %95 = arith.cmpi slt, %3, %94 : vector<1x256xi32>
    %cst_22 = arith.constant 0.000000e+00 : f32
    %96 = vector.shape_cast %95 : vector<1x256xi1> to vector<1x256xi1>
    %97 = vector.broadcast %96 : vector<1x256xi1> to vector<4x256xi1>
    %98 = vector.broadcast %cst_22 : f32 to vector<4x256xf32>
    %99 = arith.select %97, %93, %98 : vector<4x256xi1>, vector<4x256xf32>
    %100 = vector.extract_strided_slice %2 {offsets = [7, 0, 0], sizes = [1, 4, 1], strides = [1, 1, 1]} : vector<9x4x1xf32> to vector<1x4x1xf32>
    %101 = vector.shape_cast %100 : vector<1x4x1xf32> to vector<4x1xf32>
    %102 = vector.broadcast %101 : vector<4x1xf32> to vector<4x256xf32>
    %103 = arith.mulf %99, %102 : vector<4x256xf32>
    %104 = arith.addf %92, %103 : vector<4x256xf32>
    %105 = vector.extract_strided_slice %5 {offsets = [0, 17], sizes = [4, 256], strides = [1, 1]} : vector<4x512xf32> to vector<4x256xf32>
    %c15_i32_23 = arith.constant 15 : i32
    %106 = vector.broadcast %c15_i32_23 : i32 to vector<1x256xi32>
    %107 = arith.cmpi slt, %3, %106 : vector<1x256xi32>
    %c15_i32_24 = arith.constant 15 : i32
    %108 = vector.broadcast %c15_i32_24 : i32 to vector<1x256xi32>
    %109 = arith.cmpi slt, %4, %108 : vector<1x256xi32>
    %110 = arith.andi %107, %109 : vector<1x256xi1>
    %cst_25 = arith.constant 0.000000e+00 : f32
    %111 = vector.shape_cast %110 : vector<1x256xi1> to vector<1x256xi1>
    %112 = vector.broadcast %111 : vector<1x256xi1> to vector<4x256xi1>
    %113 = vector.broadcast %cst_25 : f32 to vector<4x256xf32>
    %114 = arith.select %112, %105, %113 : vector<4x256xi1>, vector<4x256xf32>
    %115 = vector.extract_strided_slice %2 {offsets = [8, 0, 0], sizes = [1, 4, 1], strides = [1, 1, 1]} : vector<9x4x1xf32> to vector<1x4x1xf32>
    %116 = vector.shape_cast %115 : vector<1x4x1xf32> to vector<4x1xf32>
    %117 = vector.broadcast %116 : vector<4x1xf32> to vector<4x256xf32>
    %118 = arith.mulf %114, %117 : vector<4x256xf32>
    %119 = arith.addf %104, %118 : vector<4x256xf32>
    %c0_26 = arith.constant 0 : index
    %c0_27 = arith.constant 0 : index
    %c0_28 = arith.constant 0 : index
    %120 = vector.load %arg4[%c0_26, %c0_27, %c0_28] : memref<4x8x1xf32, #tpu.memory_space<vmem>>, vector<4x8x1xf32>
    %cst_29 = arith.constant 0.000000e+00 : f32
    %121 = vector.broadcast %cst_29 : f32 to vector<8x256xf32>
    %122 = vector.extract_strided_slice %119 {offsets = [0, 0], sizes = [1, 256], strides = [1, 1]} : vector<4x256xf32> to vector<1x256xf32>
    %123 = vector.extract_strided_slice %120 {offsets = [0, 0, 0], sizes = [1, 8, 1], strides = [1, 1, 1]} : vector<4x8x1xf32> to vector<1x8x1xf32>
    %124 = vector.shape_cast %123 : vector<1x8x1xf32> to vector<8x1xf32>
    %125 = vector.broadcast %122 : vector<1x256xf32> to vector<8x256xf32>
    %126 = vector.broadcast %124 : vector<8x1xf32> to vector<8x256xf32>
    %127 = arith.mulf %125, %126 : vector<8x256xf32>
    %128 = arith.addf %121, %127 : vector<8x256xf32>
    %129 = vector.extract_strided_slice %119 {offsets = [1, 0], sizes = [1, 256], strides = [1, 1]} : vector<4x256xf32> to vector<1x256xf32>
    %130 = vector.extract_strided_slice %120 {offsets = [1, 0, 0], sizes = [1, 8, 1], strides = [1, 1, 1]} : vector<4x8x1xf32> to vector<1x8x1xf32>
    %131 = vector.shape_cast %130 : vector<1x8x1xf32> to vector<8x1xf32>
    %132 = vector.broadcast %129 : vector<1x256xf32> to vector<8x256xf32>
    %133 = vector.broadcast %131 : vector<8x1xf32> to vector<8x256xf32>
    %134 = arith.mulf %132, %133 : vector<8x256xf32>
    %135 = arith.addf %128, %134 : vector<8x256xf32>
    %136 = vector.extract_strided_slice %119 {offsets = [2, 0], sizes = [1, 256], strides = [1, 1]} : vector<4x256xf32> to vector<1x256xf32>
    %137 = vector.extract_strided_slice %120 {offsets = [2, 0, 0], sizes = [1, 8, 1], strides = [1, 1, 1]} : vector<4x8x1xf32> to vector<1x8x1xf32>
    %138 = vector.shape_cast %137 : vector<1x8x1xf32> to vector<8x1xf32>
    %139 = vector.broadcast %136 : vector<1x256xf32> to vector<8x256xf32>
    %140 = vector.broadcast %138 : vector<8x1xf32> to vector<8x256xf32>
    %141 = arith.mulf %139, %140 : vector<8x256xf32>
    %142 = arith.addf %135, %141 : vector<8x256xf32>
    %143 = vector.extract_strided_slice %119 {offsets = [3, 0], sizes = [1, 256], strides = [1, 1]} : vector<4x256xf32> to vector<1x256xf32>
    %144 = vector.extract_strided_slice %120 {offsets = [3, 0, 0], sizes = [1, 8, 1], strides = [1, 1, 1]} : vector<4x8x1xf32> to vector<1x8x1xf32>
    %145 = vector.shape_cast %144 : vector<1x8x1xf32> to vector<8x1xf32>
    %146 = vector.broadcast %143 : vector<1x256xf32> to vector<8x256xf32>
    %147 = vector.broadcast %145 : vector<8x1xf32> to vector<8x256xf32>
    %148 = arith.mulf %146, %147 : vector<8x256xf32>
    %149 = arith.addf %142, %148 : vector<8x256xf32>
    %c0_30 = arith.constant 0 : index
    %c0_31 = arith.constant 0 : index
    %150 = vector.load %arg5[%c0_30, %c0_31] : memref<8x1xf32, #tpu.memory_space<vmem>>, vector<8x1xf32>
    %151 = vector.broadcast %150 : vector<8x1xf32> to vector<8x256xf32>
    %152 = arith.addf %149, %151 : vector<8x256xf32>
    %153 = vector.shape_cast %152 : vector<8x256xf32> to vector<1x8x256xf32>
    %c0_32 = arith.constant 0 : index
    %c0_33 = arith.constant 0 : index
    %c0_34 = arith.constant 0 : index
    %154 = vector.load %arg6[%c0_32, %c0_33, %c0_34] : memref<1x8x256xf32, #tpu.memory_space<vmem>>, vector<1x8x256xf32>
    tpu.vector_store %arg6[%c0_32, %c0_33, %c0_34], %153 {strides = array<i32>} : memref<1x8x256xf32, #tpu.memory_space<vmem>>, vector<1x8x256xf32>,
    return
  }
  func.func @transform_0(%arg0: i32) -> (i32, i32, i32) {
    %c0_i32 = arith.constant 0 : i32
    %c0_i32_0 = arith.constant 0 : i32
    %c0_i32_1 = arith.constant 0 : i32
    return %arg0, %c0_i32, %c0_i32_0 : i32, i32, i32
  }
  func.func @transform_1(%arg0: i32) -> (i32, i32) {
    %c0_i32 = arith.constant 0 : i32
    %c0_i32_0 = arith.constant 0 : i32
    %c0_i32_1 = arith.constant 0 : i32
    return %c0_i32, %c0_i32_0 : i32, i32
  }
  func.func @transform_2(%arg0: i32) -> (i32, i32, i32) {
    %c0_i32 = arith.constant 0 : i32
    %c0_i32_0 = arith.constant 0 : i32
    %c0_i32_1 = arith.constant 0 : i32
    %c0_i32_2 = arith.constant 0 : i32
    return %c0_i32, %c0_i32_0, %c0_i32_1 : i32, i32, i32
  }
  func.func @transform_3(%arg0: i32) -> (i32, i32, i32) {
    %c0_i32 = arith.constant 0 : i32
    %c0_i32_0 = arith.constant 0 : i32
    %c0_i32_1 = arith.constant 0 : i32
    %c0_i32_2 = arith.constant 0 : i32
    return %c0_i32, %c0_i32_0, %c0_i32_1 : i32, i32, i32
  }
  func.func @transform_4(%arg0: i32) -> (i32, i32) {
    %c0_i32 = arith.constant 0 : i32
    %c0_i32_0 = arith.constant 0 : i32
    %c0_i32_1 = arith.constant 0 : i32
    return %c0_i32, %c0_i32_0 : i32, i32
  }
  func.func @transform_5(%arg0: i32) -> (i32, i32, i32) {
    %c0_i32 = arith.constant 0 : i32
    %c0_i32_0 = arith.constant 0 : i32
    %c0_i32_1 = arith.constant 0 : i32
    return %arg0, %c0_i32, %c0_i32_0 : i32, i32, i32
  }
}

</mosaic_0001>

<bundles_post_ra>
// kernel: tpu_custom_call.1
= control target key start
LH: loop header
LB: loop body
LE: loop exit
PB: predicated region body
PF: predicated region fallthrough
CT: control target
= control target key end

     0   :  { %10 = vsyncpa [#allocation3], 0  ;;  %s1069_s0 = inlined_call_operand.vmem [shape: f32[2,4,256], index: 0, kind: input, shape index: {}]   ;;  %s1070_s1 = inlined_call_operand.vmem [shape: s32[2,256], index: 1, kind: input, shape index: {}]   ;;  %s1071_s2 = inlined_call_operand.vmem [shape: f32[9,4,1], index: 2, kind: input, shape index: {}]   ;;  %s1072_s3 = inlined_call_operand.vmem [shape: f32[4,8,1], index: 3, kind: input, shape index: {}]   ;;  %s1073_s4 = inlined_call_operand.vmem [shape: f32[8,1], index: 4, kind: input, shape index: {}]   ;;  %s1074_s5 = inlined_call_operand.hbm [shape: f32[2,8,256], index: 5, kind: output, shape index: {}]  }
   0x1   :  { %12 = vsyncpa [#allocation3 + $0x1], 0  ;;  %s790_s18 = smov 0   ;;  %s792_s19 = smov 0  }
   0x2   :  { %s794_s20 = smov 0   ;;  %s796_s21 = smov 0  }
   0x3 LB: > { %s811_s22 = sadd.s32 4294967295, %s748_s21   ;;  %s619_s23 = sadd.s32 4294967294, %s748_s21   ;;  %s748_s21 = sphi %s796_s21, %s1100_s21   ;;  %s744_s20 = sphi %s794_s20, %s1099_s20   ;;  %s740_s19 = sphi %s792_s19, %s1098_s19   ;;  %s736_s18 = sphi %s790_s18, %s1097_s18  }
   0x4   : > { %s815_s24 = sadd.s32 1, %s748_s21   ;;  %s135_s25 = sadd.s32 1, %s744_s20 }
   0x5   : > { %s132_s26 = ssub.s32 %s748_s21, %s815_s24  ;;  %p145_p0 = scmp.ne.s32.totalorder %s744_s20, %s740_s19 }
   0x6   : > { %p133_p1 = scmp.eq.s32.totalorder %s132_s26, 0  ;;  %p146_p2 = scmp.eq.s32.totalorder %s811_s22, 1 }
   0x7   : > { %p151_p3 = scmp.ne.s32.totalorder %s740_s19, %s736_s18  ;;  %p152_p4 = scmp.eq.s32.totalorder %s619_s23, 1 }
   0x8   : > { %s826_s27 = scalar_select %p133_p1, %s744_s20, %s135_s25  }
   0x9   : > { %p828_p5 = por %p146_p2, %p145_p0  ;;  %p832_p6 = por %p152_p4, %p151_p3 }
   0xa   : > { %p622_p7 = scmp.ge.s32.totalorder %s748_s21, 1  ;;  %p190_p8 = scmp.lt.s32.totalorder %s748_s21, 3 }
   0xc   : > { %p191_p9 = pnand %p622_p7, %p190_p8 }
   0xd   : > { %p218_p10 = scmp.lt.s32.totalorder (!%p191_p9), %s811_s22, 1  ;;  %s751_s14 = smov (!%p191_p9), 16  }
   0xe   : > { %194 = sbr.rel (%p191_p9) target bundleno = 248 (0xf8), region = 40  ;;  %s752_s15 = smov (!%p191_p9), 17  }
   0xf   : > { %s753_s16 = smov (!%p191_p9), 15   ;;  %s754_s25 = smov (!%p191_p9), 1  }
  0x10   : > { %s758_s17 = smov (!%p191_p9), 111   ;;  %s215_s23 = sand.u32 (!%p191_p9), 1, %s740_s19  }
  0x11   : > { %s633_s26 = sshll.u32 (!%p191_p9), %s811_s22, 4  ;;  %s544_s10 = scalar_lea.sflag (!%p191_p9), [#allocation3], %s215_s23 }
  0x13   : > { %v224_v0 = vld [vmem:[%s1071_s2] sm:$0xf]  ;;  %v750_v1 = vmov 0   ;;  %s219_s7 = scalar_select %p218_p10, %s811_s22, 1  ;;  %v225_v3 = vld [vmem:[%s1071_s2 + $0x4] sm:$0xf] }
  0x14   : > { %683 = vset.pattern.permute.xlu1 %v750_v1  ;;  %684 = vset.pattern.permute.xlu2 %v750_v1  ;;  %v226_v8 = vld [vmem:[%s1071_s2 + $0x8] sm:$0xf]  ;;  %v228_v9 = vld [vmem:[%s1071_s2 + $0x10] sm:$0xf]  ;;  %v227_v10 = vld [vmem:[%s1071_s2 + $0xc] sm:$0xf] }
  0x15   : > { %266 = vperm.xlu1 %683, %v224_v0   ;;  %685 = vset.pattern.permute.xlu0 %v750_v1  ;;  %s632_s8 = sshll.u32 %s219_s7, 3  ;;  %v229_v11 = vld [vmem:[%s1071_s2 + $0x14] sm:$0xf]  ;;  %v230_v12 = vld [vmem:[%s1071_s2 + $0x18] sm:$0xf]  ;;  %v485_v14 = vld [vmem:[%s1072_s3] sm:$0xff]  ;;  %s555_s7 = scalar_lea.hbm %s1074_s5, %s633_s26 }
  0x16   : > { %s222_s11 = scalar_lea.vmem %s1069_s0, %s632_s8  ;;  %s755_s8 = smov 127   ;;  %v231_v13 = vld [vmem:[%s1071_s2 + $0x1c] sm:$0xf]  ;;  %v232_v15 = vld [vmem:[%s1071_s2 + $0x20] sm:$0xf]  ;;  %v486_v17 = vld [vmem:[%s1072_s3 + $0x8] sm:$0xff] }
  0x17   : > { %v849_v2 = vld [vmem:[%s222_s11] sm:$0xff]  ;;  %s756_s11 = smov 113   ;;  %v488_v16 = vld [vmem:[%s1072_s3 + $0x18] sm:$0xff]  ;;  %v487_v18 = vld [vmem:[%s1072_s3 + $0x10] sm:$0xff]  ;;  %vm284_vm1 = vcmask 130048   ;;  %vm257_vm5 = vcmask 138240  }
  0x18   : > { %237 = vst [vmem:[#allocation1] ss:$2 sm:$0xff] %v849_v2  ;;  %v892_v20 = vld [vmem:[%s1070_s1] ss:$2 sm:$0x3]  ;;  %vm313_vm11 = vcmask 121856  }
  0x19   : > { %v533_v21 = vld [vmem:[%s1073_s4] sm:$0xff]  ;;  %vm243_vm0 = vcmp.ge.s32.totalorder %v892_v20, 1  ;;  %v759_v56 = vmov 839922192   ;;  %vm401_vm12 = vcmp.lt.s32.totalorder %v892_v20, 15  ;;  %s559_s9 = sshll.u32 %s555_s7, 4  ;;  %s560_s9 = int_to_ptr.hbm [resolvable:$true] %s559_s9 }
  0x1a   : > { %v273_v23 = vsel %vm243_vm0, 1, %v750_v1  ;;  %v906_v27 = vld [vmem:[%s1070_s1 + $0x1] ss:$2 sm:$0x3]  ;;  %v361_v57 = vunpack.c.l.s4 %v759_v56 }
  0x1b   : > { %v274_v25 = vperm.slane %v273_v23, 0  ;;  %vm244_vm3 = vcmp.ge.s32.totalorder %v906_v27, 1  ;;  %v275_v42 = vperm.slane %v273_v23, 1  ;;  %vm300_vm9 = vcmp.lt.s32.totalorder %v906_v27, 15 }
  0x1c   : > { %vm245_vm4 = vmand %vm243_vm0, %vm244_vm3  ;;  %v362_v59 = vunpack.c.0.s8 %v361_v57 }
  0x1d   : > { %293 = vperm.xlu1 %683, %v225_v3   ;;  %vm276_vm2 = vcmp.eq.s32.totalorder %v274_v25, 1  ;;  %v246_v33 = vsel %vm245_vm4, 1, %v750_v1  ;;  %vm277_vm8 = vcmp.eq.s32.totalorder %v275_v42, 1  ;;  %vm301_vm10 = vmand %vm243_vm0, %vm300_vm9  ;;  %vm340_vm0 = vcmask 7168  }
  0x1e   : > { %v247_v34 = vperm.slane %v246_v33, 0  ;;  %v248_v38 = vperm.slane %v246_v33, 1  ;;  %vm402_vm15 = vmand %vm401_vm12, %vm244_vm3 }
  0x1f   : > { %v239_v4 = vld.sshfl [vmem:[#allocation1 + $0x8] sm:$0xff pattern:$0x75316420]  ;;  %v238_v5 = vld.sshfl [vmem:[#allocation1] sm:$0xff pattern:$0x75316420]  ;;  %vm457_vm4 = vmand %vm401_vm12, %vm300_vm9 }
  0x20   : > { %278 = vrot.lane.b32.xlu2 %v239_v4, %s751_s14  ;;  %251 = vrot.lane.b32.xlu0 %v239_v4, %s752_s15  ;;  %240 = vst [vmem:[#allocation1] ss:$2 sm:$0xff] %v849_v2  ;;  %vm249_vm6 = vcmp.eq.s32.totalorder %v247_v34, 1  ;;  %vm250_vm7 = vcmp.eq.s32.totalorder %v248_v38, 1 }
  0x27   : > { %v242_v6 = vld.sshfl [vmem:[#allocation1 + $0x8] sm:$0xff pattern:$0x75316420]  ;;  %v241_v7 = vld.sshfl [vmem:[#allocation1] sm:$0xff pattern:$0x75316420] }
  0x28   : > { %307 = vrot.lane.b32.xlu2 %v239_v4, %s753_s16  ;;  %255 = vrot.lane.b32.xlu1 %v242_v6, %s752_s15 }
  0x29   : > { %253 = vrot.lane.b32.xlu0 %v241_v7, %s752_s15  ;;  %s706_s15 = scalar_lea.hbm %s1074_s5, 32 }
  0x30   : > { %311 = vrot.lane.b32.xlu1 %v242_v6, %s753_s16  ;;  %280 = vrot.lane.b32.xlu2 %v241_v7, %s751_s14 }
  0x31   : > { %282 = vrot.lane.b32.xlu0 %v242_v6, %s751_s14  ;;  %s757_s14 = smov 112  }
  0x38   : > { %336 = vrot.lane.b32.xlu1 %v241_v7, %s754_s25  ;;  %322 = vperm.xlu2 %684, %v226_v8   ;;  %v302_v8 = vsel %vm301_vm10, 1, %v750_v1 }
  0x39   : > { %309 = vrot.lane.b32.xlu0 %v241_v7, %s753_s16 }
  0x40   : > { %358 = vperm.xlu1 %683, %v228_v9   ;;  %338 = vrot.lane.b32.xlu2 %v242_v6, %s754_s25  ;;  %v304_v9 = vperm.slane %v302_v8, 1 }
  0x41   : > { %334 = vrot.lane.b32.xlu0 %v239_v4, %s754_s25  ;;  %s623_s25 = sshll.u32 %s215_s23, 4 }
  0x42   : > { %vm946_vm14 = vcmp.eq.s32.totalorder %v304_v9, 1  ;;  %s217_s22 = scalar_lea.vmem [#allocation2], %s623_s25 }
  0x48   : > { %381 = vrot.lane.b32.xlu1 %v239_v4, %s755_s8  ;;  %379 = vrot.lane.b32.xlu2 %v238_v5, %s755_s8 }
  0x49   : > { %349 = vperm.xlu0 %685, %v227_v10  }
  0x50   : > { %408 = vrot.lane.b32.xlu1 %v238_v5, %s756_s11  ;;  %383 = vrot.lane.b32.xlu2 %v241_v7, %s755_s8  ;;  %s557_s8 = sshll.u32 %s217_s22, 4  ;;  %s558_s8 = int_to_ptr.vmem [resolvable:$true] %s557_s8 }
  0x51   : > { %394 = vperm.xlu0 %685, %v229_v11   ;;  %v329_v11 = vsel %vm244_vm3, 1, %v750_v1  ;;  %vm385_vm3 = vcmask 1039360  }
  0x58   : > { %423 = vperm.xlu1 %683, %v230_v12   ;;  %410 = vrot.lane.b32.xlu2 %v239_v4, %s756_s11 }
  0x59   : > { %412 = vrot.lane.b32.xlu0 %v241_v7, %s756_s11  ;;  %s700_s11 = sshra.s32 %s560_s9, 4  ;;  %s701_s11 = int_to_ptr.hbm [resolvable:$true] %s700_s11 }
  0x5a   : > { %s702_s12 = scalar_lea.hbm %s701_s11, 16  ;;  %p707_p0 = scmp.lt.s32.totalorder %s701_s11, %s1074_s5 }
  0x5b   : > { %p703_p11 = scmp.ne.s32.totalorder %s701_s11, %s702_s12  ;;  %p708_p1 = scmp.lt.s32.totalorder %s706_s15, %s702_s12 }
  0x5d   : > { %p704_p12 = pnand %p703_p11, %p828_p5  ;;  %p709_p2 = por %p708_p1, %p707_p0 }
  0x5f   : > { %p705_p13 = pneg %p704_p12 }
  0x60   : > { %439 = vrot.lane.b32.xlu1 %v241_v7, %s757_s14  ;;  %435 = vrot.lane.b32.xlu2 %v238_v5, %s757_s14 }
  0x61   : > { %437 = vrot.lane.b32.xlu0 %v239_v4, %s757_s14  ;;  %p710_p3 = pnand %p709_p2, %p705_p13 }
  0x68   : > { %465 = vrot.lane.b32.xlu1 %v239_v4, %s758_s17  ;;  %450 = vperm.xlu2 %684, %v231_v13  }
  0x69   : > { %463 = vrot.lane.b32.xlu0 %v238_v5, %s758_s17 }
  0x70   : > { %493 = vperm.xlu1 %683, %v485_v14   ;;  %467 = vrot.lane.b32.xlu2 %v241_v7, %s758_s17 }
  0x71   : > { %478 = vperm.xlu0 %685, %v232_v15  }
  0x78   : > { %526 = vperm.xlu1 %683, %v488_v16   ;;  %504 = vperm.xlu2 %684, %v486_v17   ;;  %v330_v16 = vperm.slane %v329_v11, 0 }
  0x79   : > { %515 = vperm.xlu0 %685, %v487_v18  }
  0x7a   : > { %v279_v19 = vpop.permute.xlu2 %278 }
  0x80   : > { %536 = vperm.xlu2 %684, %v533_v21   ;;  %v374_v21 = vsel %vm300_vm9, 1, %v750_v1  ;;  %vm441_vm9 = vcmask 916480  }
  0x81   : > { %v376_v33 = vperm.slane %v374_v21, 1 }
  0x82   : > { %v898_v22 = vpop.permute.xlu2 %307 }
  0x87   : > { %v267_v24 = vpop.permute.xlu1 %266 }
  0x8a   : > { %v281_v26 = vpop.permute.xlu2 %280 }
  0x8b   : > { %v285_v28 = vsel %vm284_vm1, %v279_v19, %v281_v26  ;;  %v331_v19 = vperm.slane %v329_v11, 1 }
  0x8c   : > { %v289_v29 = vsel %vm276_vm2, %v285_v28, 0.0 }
  0x8d   : > { %vm966_vm2 = vcmp.eq.s32.totalorder %v331_v19, 1 }
  0x8f   : > { %v294_v30 = vpop.permute.xlu1 %293 }
  0x90   : > { %v296_v31 = vmul.f32 %v294_v30, %v289_v29 }
  0x92   : > { %v252_v32 = vpop.permute.xlu0 %251  ;;  %v915_v35 = vpop.permute.xlu2 %322 }
  0x9a   : > { %v256_v36 = vpop.permute.xlu1 %255  ;;  %v339_v45 = vpop.permute.xlu2 %338 }
  0x9b   : > { %v254_v37 = vpop.permute.xlu0 %253 }
  0x9c   : > { %v258_v39 = vsel %vm257_vm5, %v252_v32, %v254_v37  ;;  %v259_v43 = vsel %vm257_vm5, %v254_v37, %v256_v36  ;;  %vm414_vm5 = vcmask 924672  }
  0x9d   : > { %v262_v40 = vsel %vm249_vm6, %v258_v39, 0.0  ;;  %v263_v47 = vsel %vm250_vm7, %v259_v43, 0.0  ;;  %vm989_vm7 = vcmp.eq.s32.totalorder %v376_v33, 1 }
  0x9e   : > { %v269_v41 = vmul.f32 %v267_v24, %v262_v40  ;;  %v270_v51 = vmul.f32 %v267_v24, %v263_v47 }
  0xa0   : > { %v917_v44 = vadd.f32 %v296_v31, %v269_v41  ;;  %v430_v31 = vsel %vm401_vm12, 1, %v750_v1 }
  0xa1   : > { %v432_v47 = vperm.slane %v430_v31, 1 }
  0xa2   : > { %v312_v46 = vpop.permute.xlu1 %311  ;;  %v380_v58 = vpop.permute.xlu2 %379 }
  0xa3   : > { %v283_v48 = vpop.permute.xlu0 %282  ;;  %vm1012_vm12 = vcmp.eq.s32.totalorder %v432_v47, 1 }
  0xa4   : > { %v286_v49 = vsel %vm284_vm1, %v281_v26, %v283_v48  ;;  %vm961_vm1 = vcmp.eq.s32.totalorder %v330_v16, 1  ;;  %v403_v26 = vsel %vm402_vm15, 1, %v750_v1 }
  0xa5   : > { %v290_v50 = vsel %vm277_vm8, %v286_v49, 0.0  ;;  %v404_v38 = vperm.slane %v403_v26, 0  ;;  %v405_v43 = vperm.slane %v403_v26, 1  ;;  %v458_v49 = vsel %vm457_vm4, 1, %v750_v1 }
  0xa6   : > { %v297_v52 = vmul.f32 %v294_v30, %v290_v50  ;;  %v375_v30 = vperm.slane %v374_v21, 0  ;;  %v460_v11 = vperm.slane %v458_v49, 1 }
  0xa7   : > { %vm996_vm8 = vcmp.eq.s32.totalorder %v404_v38, 1  ;;  %vm1000_vm10 = vcmp.eq.s32.totalorder %v405_v43, 1 }
  0xa8   : > { %v920_v53 = vadd.f32 %v297_v52, %v270_v51  ;;  %vm983_vm6 = vcmp.eq.s32.totalorder %v375_v30, 1  ;;  %vm462_vm15 = vcmp.eq.s32.totalorder %v460_v11, 1 }
  0xaa   : > { %v337_v54 = vpop.permute.xlu1 %336  ;;  %v384_v0 = vpop.permute.xlu2 %383 }
  0xab   : > { %v310_v55 = vpop.permute.xlu0 %309  ;;  %v342_v28 = vsel %vm340_vm0, %v337_v54, %v339_v45  ;;  %v431_v45 = vperm.slane %v430_v31, 0 }
  0xac   : > { %v314_v15 = vsel %vm313_vm11, %v898_v22, %v310_v55  ;;  %v315_v18 = vsel %vm313_vm11, %v310_v55, %v312_v46  ;;  %v346_v40 = vsel %vm966_vm2, %v342_v28, 0.0 }
  0xad   : > { %v319_v23 = vsel %vm946_vm14, %v315_v18, 0.0  ;;  %vm1006_vm11 = vcmp.eq.s32.totalorder %v431_v45, 1 }
  0xae   : > { %v326_v36 = vmul.f32 %v915_v35, %v319_v23 }
  0xb0   : > { %v328_v51 = vadd.f32 %v326_v36, %v920_v53 }
  0xb2   : > { %v359_v60 = vpop.permute.xlu1 %358  ;;  %v924_v5 = vpop.permute.xlu2 %410 }
  0xb3   : > { %v363_v61 = vperm.slane %v359_v60, %v362_v59  ;;  %v335_v62 = vpop.permute.xlu0 %334  ;;  %v459_v59 = vperm.slane %v458_v49, 0 }
  0xb4   : > { %v341_v24 = vsel %vm340_vm0, %v335_v62, %v337_v54 }
  0xb5   : > { %v365_v63 = vmul.f32 %v363_v61, %v849_v2  ;;  %v303_v2 = vperm.slane %v302_v8, 0  ;;  %v345_v37 = vsel %vm961_vm1, %v341_v24, 0.0  ;;  %vm461_vm14 = vcmp.eq.s32.totalorder %v459_v59, 1 }
  0xb7   : > { %367 = vst [vmem:[#allocation1] ss:$2 sm:$0xff] %v365_v63  ;;  %vm941_vm13 = vcmp.eq.s32.totalorder %v303_v2, 1 }
  0xb8   : > { %v318_v22 = vsel %vm941_vm13, %v314_v15, 0.0  ;;  %vm469_vm13 = vcmask 908288  }
  0xb9   : > { %v325_v32 = vmul.f32 %v915_v35, %v318_v22 }
  0xba   : > { %v382_v3 = vpop.permute.xlu1 %381  ;;  %v436_v10 = vpop.permute.xlu2 %435 }
  0xbb   : > { %v350_v4 = vpop.permute.xlu0 %349  ;;  %v386_v48 = vsel %vm385_vm3, %v380_v58, %v382_v3  ;;  %v327_v27 = vadd.f32 %v325_v32, %v917_v44  ;;  %v387_v50 = vsel %vm385_vm3, %v382_v3, %v384_v0 }
  0xbc   : > { %v352_v41 = vmul.f32 %v350_v4, %v345_v37  ;;  %v353_v46 = vmul.f32 %v350_v4, %v346_v40  ;;  %v390_v53 = vsel %vm983_vm6, %v386_v48, 0.0  ;;  %v391_v62 = vsel %vm989_vm7, %v387_v50, 0.0 }
  0xbe   : > { %v354_v54 = vadd.f32 %v352_v41, %v327_v27  ;;  %v355_v1 = vadd.f32 %v353_v46, %v328_v51  ;;  %v368_v57 = vld.sshfl [vmem:[#allocation1] sm:$0xff pattern:$0x75316420]  ;;  %v369_v61 = vld.sshfl [vmem:[#allocation1 + $0x8] sm:$0xff pattern:$0x75316420] }
  0xc0   : > { %v373_v14 = vadd.f32 %v369_v61, %v355_v1 }
  0xc2   : > { %v930_v6 = vpop.permute.xlu1 %408  ;;  %v451_v42 = vpop.permute.xlu2 %450 }
  0xc3   : > { %v932_v7 = vpop.permute.xlu0 %394  ;;  %v415_v60 = vsel %vm414_vm5, %v930_v6, %v924_v5 }
  0xc4   : > { %v397_v4 = vmul.f32 %v932_v7, %v390_v53  ;;  %v398_v8 = vmul.f32 %v932_v7, %v391_v62 }
  0xc6   : > { %v400_v18 = vadd.f32 %v398_v8, %v373_v14 }
  0xca   : > { %v939_v12 = vpop.permute.xlu1 %423  ;;  %v468_v7 = vpop.permute.xlu2 %467 }
  0xcb   : > { %v413_v13 = vpop.permute.xlu0 %412 }
  0xcc   : > { %v416_v44 = vsel %vm414_vm5, %v924_v5, %v413_v13  ;;  %v372_v13 = vadd.f32 %v368_v57, %v354_v54  ;;  %v419_v5 = vsel %vm996_vm8, %v415_v60, 0.0 }
  0xcd   : > { %v420_v2 = vsel %vm1000_vm10, %v416_v44, 0.0  ;;  %v426_v15 = vmul.f32 %v939_v12, %v419_v5 }
  0xce   : > { %v427_v16 = vmul.f32 %v939_v12, %v420_v2  ;;  %v399_v17 = vadd.f32 %v397_v4, %v372_v13 }
  0xd0   : > { %v428_v24 = vadd.f32 %v426_v15, %v399_v17  ;;  %v429_v25 = vadd.f32 %v427_v16, %v400_v18 }
  0xd2   : > { %v440_v34 = vpop.permute.xlu1 %439  ;;  %v505_v37 = vpop.permute.xlu2 %504 }
  0xd3   : > { %v438_v39 = vpop.permute.xlu0 %437 }
  0xd4   : > { %v442_v63 = vsel %vm441_vm9, %v436_v10, %v438_v39  ;;  %v443_v0 = vsel %vm441_vm9, %v438_v39, %v440_v34 }
  0xd5   : > { %v446_v6 = vsel %vm1006_vm11, %v442_v63, 0.0  ;;  %v447_v10 = vsel %vm1012_vm12, %v443_v0, 0.0 }
  0xd6   : > { %v453_v19 = vmul.f32 %v451_v42, %v446_v6  ;;  %v454_v21 = vmul.f32 %v451_v42, %v447_v10 }
  0xd8   : > { %v455_v31 = vadd.f32 %v453_v19, %v428_v24  ;;  %v456_v32 = vadd.f32 %v454_v21, %v429_v25 }
  0xda   : > { %v466_v3 = vpop.permute.xlu1 %465  ;;  %v537_v58 = vpop.permute.xlu2 %536 }
  0xdb   : > { %v464_v9 = vpop.permute.xlu0 %463  ;;  %v471_v22 = vsel %vm469_vm13, %v466_v3, %v468_v7 }
  0xdc   : > { %v470_v23 = vsel %vm469_vm13, %v464_v9, %v466_v3  ;;  %v475_v29 = vsel %vm462_vm15, %v471_v22, 0.0 }
  0xdd   : > { %v474_v28 = vsel %vm461_vm14, %v470_v23, 0.0 }
  0xe2   : > { %v494_v26 = vpop.permute.xlu1 %493 }
  0xe3   : > { %v479_v30 = vpop.permute.xlu0 %478 }
  0xe4   : > { %v481_v33 = vmul.f32 %v479_v30, %v474_v28  ;;  %v482_v34 = vmul.f32 %v479_v30, %v475_v29 }
  0xe6   : > { %v483_v12 = vadd.f32 %v481_v33, %v455_v31  ;;  %v484_v36 = vadd.f32 %v482_v34, %v456_v32 }
  0xe8   : > { %v489_v38 = vperm.slane %v483_v12, 0  ;;  %v490_v39 = vperm.slane %v484_v36, 0  ;;  %v500_v40 = vperm.slane %v483_v12, 1  ;;  %v501_v41 = vperm.slane %v484_v36, 1 }
  0xe9   : > { %v511_v45 = vperm.slane %v483_v12, 2  ;;  %v512_v46 = vperm.slane %v484_v36, 2  ;;  %v522_v50 = vperm.slane %v483_v12, 3  ;;  %v523_v51 = vperm.slane %v484_v36, 3 }
  0xea   : > { %v496_v42 = vmul.f32 %v494_v26, %v489_v38  ;;  %v497_v43 = vmul.f32 %v494_v26, %v490_v39  ;;  %v507_v35 = vmul.f32 %v505_v37, %v500_v40  ;;  %v508_v47 = vmul.f32 %v505_v37, %v501_v41  ;;  %v527_v27 = vpop.permute.xlu1 %526 }
  0xeb   : > { %v516_v48 = vpop.permute.xlu0 %515  ;;  %v529_v55 = vmul.f32 %v527_v27, %v522_v50  ;;  %v530_v44 = vmul.f32 %v527_v27, %v523_v51 }
  0xec   : > { %v518_v20 = vmul.f32 %v516_v48, %v511_v45  ;;  %v519_v49 = vmul.f32 %v516_v48, %v512_v46  ;;  %v509_v52 = vadd.f32 %v507_v35, %v496_v42  ;;  %v510_v54 = vadd.f32 %v508_v47, %v497_v43 }
  0xee   : > { %v520_v56 = vadd.f32 %v518_v20, %v509_v52  ;;  %v521_v1 = vadd.f32 %v519_v49, %v510_v54 }
  0xf0   : > { %v531_v57 = vadd.f32 %v529_v55, %v520_v56  ;;  %v532_v53 = vadd.f32 %v530_v44, %v521_v1 }
  0xf2   : > { %v539_v59 = vadd.f32 %v537_v58, %v531_v57  ;;  %v540_v60 = vadd.f32 %v537_v58, %v532_v53 }
  0xf4   : > { %541 = vst [vmem:[%s217_s22] sm:$0xff] %v539_v59 }
  0xf5   : > { %542 = vst [vmem:[%s217_s22 + $0x8] sm:$0xff] %v540_v60 }
  0xf6   : > { %713 = shalt.err (!%p710_p3)
}
  0xf7   : > { %634 = dma.vmem_to_hbm [thread:$0]  (%p828_p5), %s558_s8, 256, %s560_s9, %s544_s10  }
  0xf8 PF: > { %p640_p4 = scmp.ge.s32.totalorder %s748_s21, 2  ;;  %s571_s23 = sand.u32 1, %s736_s18  }
  0xf9   : > { %s572_s25 = scalar_lea.sflag [#allocation3], %s571_s23 }
  0xfa   : > { %p637_p7 = pnand %p640_p4, %p832_p6 }
  0xfc   : > { %p638_p8 = pneg %p637_p7 }
  0xfe   : > { %731 = dma.done.wait (%p638_p8), %s572_s25, 256  }
  0xff   : > { %733 = vsyncadd (%p638_p8), %s572_s25, 4294967040  ;;  %p15_p9 = scmp.ge.s32.totalorder %s815_s24, 4   ;;  %s1097_s18 = smov %s740_s19 }
 0x100   : > { %s1098_s19 = smov %s744_s20  ;;  %s1099_s20 = smov %s826_s27 }
 0x101   : > { %s1100_s21 = smov %s815_s24  ;;  %17 = sbr.rel (!%p15_p9) target bundleno = 3 (0x3), region = 76 }
 0x106   :  { %578 = vsyncpa [#allocation3], 1 }
 0x107   :  { %580 = vsyncpa [#allocation3 + $0x1], 1 }

</bundles_post_ra>
